<compile_context>
chip_gen: v6e
topology: v6e:2x2x1
jax: 0.10.0
libtpu: 0.0.40
codegen_flags: <defaults>
</compile_context>

<pallas_src>
import jax
import jax.numpy as jnp
from jax.experimental import pallas as pl
from jax.experimental.pallas import tpu as pltpu

LANE = 128   # f32 lane width
SUB = 8      # f32 sublane count


def _cdiv(a, b):
    return -(-a // b)


def _round_up(a, b):
    return _cdiv(a, b) * b


def nn_attention_kernel(x_ref, wa1_ref, ba1_ref, wa2_ref, ba2_ref,
                        w1_ref, b1_ref, w2_ref, b2_ref, out_ref):
    TB, S, D = x_ref.shape
    H = wa1_ref.shape[1]

    x = x_ref[...]                                       # (TB, S, D) f32

    # --- attention scoring MLP: Linear(D->H) -> tanh --------------------------
    # One well-filled (TB*S, D) @ (D, H) MXU matmul.  The leading-dim collapse is
    # layout-free only when S % 8 == 0 (f32 sublane count); otherwise use a 3-D
    # contraction and let Mosaic pick the layout (avoids a silent VMEM copy).
    if S % SUB == 0:
        xf = x.reshape(TB * S, D)
        h_att = jnp.tanh(
            jnp.dot(xf, wa1_ref[...], preferred_element_type=jnp.float32)
            + ba1_ref[...])                              # (TB*S, H)
        h3 = h_att.reshape(TB, S, H)
    else:
        h3 = jnp.tanh(
            jnp.einsum("bsd,dh->bsh", x, wa1_ref[...],
                       preferred_element_type=jnp.float32)
            + ba1_ref[...])                              # (TB, S, H)
    # NOTE(perf, v7x): if the single EUP (tanh) becomes the binding unit at
    # 3.2 TB/s HBM, cast the scoring matmul inputs to bf16 (f32 accumulation)
    # and run the tanh in bf16; keep f32 on v5e (no bf16 EUP).

    # --- H -> 1 projection on VPU/XLU (an N=1 matmul would waste the MXU) -----
    scores = jnp.sum(h3 * wa2_ref[...].reshape(1, 1, H), axis=-1) + ba2_ref[0, 0]  # (TB, S)

    # --- softmax over the sequence axis (lane axis); exact reciprocal ---------
    m = jnp.max(scores, axis=-1, keepdims=True)
    e = jnp.exp(scores - m)
    attn_w = e * (1.0 / jnp.sum(e, axis=-1, keepdims=True))   # (TB, S)

    # --- attention pooling: sum over sequence of (weights * x) ----------------
    attended = jnp.sum(attn_w[:, :, None] * x, axis=1)        # (TB, D)

    # --- head: fc1 -> relu (MXU), fc2 as VPU mul + lane reduce ----------------
    h = jnp.maximum(
        jnp.dot(attended, w1_ref[...], preferred_element_type=jnp.float32)
        + b1_ref[...], 0.0)                                    # (TB, H)
    out_row = jnp.sum(h * w2_ref[...], axis=-1) + b2_ref[0, 0]  # (TB,)

    # Lane-dense output block (1, TB): unmasked stores + one dense write DMA.
    out_ref[...] = out_row.reshape(1, TB).astype(out_ref.dtype)


def _pick_batch_tile(B, S, D, H, vmem_limit_bytes):
    """Largest lane-aligned batch tile that fits the (8,128)-padded VMEM footprint."""
    d_pad = _round_up(D, LANE)
    h_pad = _round_up(H, LANE)
    s_pad = _round_up(S, LANE)
    # Per-batch-row f32 bytes, counting lane/sublane padding: double-buffered x
    # block, a possible xf relayout copy, scoring activations, lane-padded softmax
    # rows, the attn*x product, head activations and the double-buffered out row.
    bytes_per_row = 4 * (
        2 * S * d_pad          # x block (double-buffered)
        + S * d_pad            # xf reshape copy (worst case)
        + 2 * S * h_pad        # h_att / h3
        + S * d_pad            # attn_w * x product
        + 4 * s_pad            # scores / e / attn_w / denom rows
        + 2 * d_pad + 2 * h_pad
        + 2 * SUB              # double-buffered output row (sublane padded)
    )
    # Double-buffered constant weight blocks: 2x (D,H) matrices + 4x (1,H) rows.
    fixed = 4 * 2 * (2 * _round_up(D, SUB) * h_pad + 4 * SUB * h_pad)
    budget = int(0.75 * vmem_limit_bytes) - fixed
    tb_budget = max(budget // bytes_per_row, 1)
    tb_budget = min(tb_budget, 8192)

    if tb_budget >= B:
        if B >= 2 * LANE:
            # Force >= 2 grid steps so dimension_semantics=("parallel",) can put
            # one batch half on each TensorCore (matters on v7x; ~free elsewhere).
            tb = _round_up(_cdiv(B, 2), LANE)
        else:
            tb = B                       # one block covering the whole batch
    else:
        # Lane-aligned tile so the (1, tb) output block satisfies the (8,128) rule.
        tb = max((tb_budget // LANE) * LANE, LANE)
        tb = min(tb, B)
    return tb


def neural_network_with_attention(x, params):
    """x: (B, S, D) float32 -> (B, 1) float32."""
    B, S, D = x.shape
    wa1, ba1, wa2, ba2, w1, b1, w2, b2 = params
    H = wa1.shape[1]

    # Layout plumbing: H->1 projection weights lane-dense as (1, H); scalars (1, 1).
    wa2r = wa2.reshape(1, H)
    w2r = w2.reshape(1, H)
    ba2r = ba2.reshape(1, 1)
    b2r = b2.reshape(1, 1)

    # Generation-aware VMEM limit: ~96 MiB on 128-MiB parts (v5e/v6e), ~48 MiB on
    # 64-MiB parts (v7x); conservative fallback if the query is unavailable.
    try:
        vmem_cap = pltpu.get_tpu_info().vmem_capacity_bytes
    except Exception:
        vmem_cap = 64 * 1024 * 1024
    vmem_limit_bytes = min(int(0.75 * vmem_cap), 112 * 1024 * 1024)

    tb = _pick_batch_tile(B, S, D, H, vmem_limit_bytes)
    nb = _cdiv(B, tb)   # ragged last block handled by Pallas -- no wrapper-side pad

    def const_spec(shape):
        # Same block every grid step -> DMA happens only on the first step.
        return pl.BlockSpec(shape, lambda b: (0, 0))

    smem_spec = pl.BlockSpec(memory_space=pltpu.MemorySpace.SMEM)

    out = pl.pallas_call(
        nn_attention_kernel,
        out_shape=jax.ShapeDtypeStruct((1, B), jnp.float32),
        grid=(nb,),
        in_specs=[
            pl.BlockSpec((tb, S, D), lambda b: (b, 0, 0)),   # x tile (double-buffered)
            const_spec((D, H)),                              # wa1
            const_spec((1, H)),                              # ba1
            const_spec((1, H)),                              # wa2 (reshaped to (1, H))
            smem_spec,                                       # ba2 scalar -> SMEM
            const_spec((D, H)),                              # w1
            const_spec((1, H)),                              # b1
            const_spec((1, H)),                              # w2 (reshaped to (1, H))
            smem_spec,                                       # b2 scalar -> SMEM
        ],
        out_specs=pl.BlockSpec((1, tb), lambda b: (0, b)),   # lane-dense output
        compiler_params=pltpu.CompilerParams(
            dimension_semantics=("parallel",),
            vmem_limit_bytes=vmem_limit_bytes),
    )(x, wa1, ba1, wa2r, ba2r, w1, b1, w2r, b2r)
    return out.reshape(B, 1)


def reference_forward(x, params):
    """Pure-JAX reference mirroring the PyTorch module."""
    wa1, ba1, wa2, ba2, w1, b1, w2, b2 = params
    scores = jnp.tanh(x @ wa1 + ba1) @ wa2 + ba2           # (B, S, 1)
    attn_w = jax.nn.softmax(scores, axis=1)
    attended = jnp.sum(attn_w * x, axis=1)                 # (B, D)
    h = jax.nn.relu(attended @ w1 + b1)
    return h @ w2 + b2                                     # (B, 1)


def make_params(key, input_dim, hidden_dim):
    ks = jax.random.split(key, 8)

    def init(k, shape, fan_in):
        bound = 1.0 / jnp.sqrt(fan_in)
        return jax.random.uniform(k, shape, jnp.float32, -bound, bound)

    wa1 = init(ks[0], (input_dim, hidden_dim), input_dim)
    ba1 = init(ks[1], (1, hidden_dim), input_dim)
    wa2 = init(ks[2], (hidden_dim, 1), hidden_dim)
    ba2 = init(ks[3], (1, 1), hidden_dim)
    w1 = init(ks[4], (input_dim, hidden_dim), input_dim)
    b1 = init(ks[5], (1, hidden_dim), input_dim)
    w2 = init(ks[6], (hidden_dim, 1), hidden_dim)
    b2 = init(ks[7], (1, 1), hidden_dim)
    return (wa1, ba1, wa2, ba2, w1, b1, w2, b2)


if __name__ == "__main__":
    B, S, D, H = 2, 8, 16, 32   # batch, seq, input_dim, hidden_dim
    key = jax.random.PRNGKey(0)
    kx, kp = jax.random.split(key)
    x = jax.random.normal(kx, (B, S, D), jnp.float32)
    params = make_params(kp, D, H)

    out = jax.block_until_ready(neural_network_with_attention(x, params))
    ref = reference_forward(x, params)

    assert out.shape == (B, 1)
    assert jnp.allclose(out, ref, atol=1e-3, rtol=1e-3), (out, ref)
    print("KERNEL_OK")
</pallas_src>

<mosaic_0001>
module attributes {stable_mosaic.version = 11 : i64} {
  func.func @nn_attention_kernel(%arg0: i32, %arg1: memref<2x8x16xf32, #tpu.memory_space<vmem>>, %arg2: memref<16x32xf32, #tpu.memory_space<vmem>>, %arg3: memref<1x32xf32, #tpu.memory_space<vmem>>, %arg4: memref<1x32xf32, #tpu.memory_space<vmem>>, %arg5: memref<1x1xf32, #tpu.memory_space<smem>>, %arg6: memref<16x32xf32, #tpu.memory_space<vmem>>, %arg7: memref<1x32xf32, #tpu.memory_space<vmem>>, %arg8: memref<1x32xf32, #tpu.memory_space<vmem>>, %arg9: memref<1x1xf32, #tpu.memory_space<smem>>, %arg10: memref<1x2xf32, #tpu.memory_space<vmem>>) attributes {dimension_semantics = [#tpu.dimension_semantics<parallel>], iteration_bounds = array<i64: 1>, scalar_prefetch = 0 : i64, scratch_operands = 0 : i64, tpu.core_type = #tpu.core_type<tc>, window_params = [{transform_indices = @transform_0, window_bounds = array<i64: 2, 8, 16>}, {pipeline_mode = #tpu.pipeline_mode<synchronous>, transform_indices = @transform_1, window_bounds = array<i64: 16, 32>}, {pipeline_mode = #tpu.pipeline_mode<synchronous>, transform_indices = @transform_2, window_bounds = array<i64: 1, 32>}, {pipeline_mode = #tpu.pipeline_mode<synchronous>, transform_indices = @transform_3, window_bounds = array<i64: 1, 32>}, {transform_indices = @transform_4, window_bounds = array<i64: 1, 1>}, {pipeline_mode = #tpu.pipeline_mode<synchronous>, transform_indices = @transform_5, window_bounds = array<i64: 16, 32>}, {pipeline_mode = #tpu.pipeline_mode<synchronous>, transform_indices = @transform_6, window_bounds = array<i64: 1, 32>}, {pipeline_mode = #tpu.pipeline_mode<synchronous>, transform_indices = @transform_7, window_bounds = array<i64: 1, 32>}, {transform_indices = @transform_8, window_bounds = array<i64: 1, 1>}, {transform_indices = @transform_9, window_bounds = array<i64: 1, 2>}]} {
    %c0 = arith.constant 0 : index
    %c0_0 = arith.constant 0 : index
    %c0_1 = arith.constant 0 : index
    %0 = vector.load %arg1[%c0, %c0_0, %c0_1] : memref<2x8x16xf32, #tpu.memory_space<vmem>>, vector<2x8x16xf32>
    %1 = vector.shape_cast %0 : vector<2x8x16xf32> to vector<16x16xf32>
    %c0_2 = arith.constant 0 : index
    %c0_3 = arith.constant 0 : index
    %2 = vector.load %arg2[%c0_2, %c0_3] : memref<16x32xf32, #tpu.memory_space<vmem>>, vector<16x32xf32>
    %cst = arith.constant dense<0.000000e+00> : vector<16x32xf32>
    %3 = tpu.matmul %1, %2, %cst {dimension_numbers = #tpu.dot_dimension_numbers<[1], [0], [0], [1], [0, 0, 1, 1], [], []>} : vector<16x16xf32>, vector<16x32xf32>, vector<16x32xf32> -> vector<16x32xf32>
    %c0_4 = arith.constant 0 : index
    %c0_5 = arith.constant 0 : index
    %4 = vector.load %arg3[%c0_4, %c0_5] : memref<1x32xf32, #tpu.memory_space<vmem>>, vector<1x32xf32>
    %5 = vector.broadcast %4 : vector<1x32xf32> to vector<16x32xf32>
    %6 = arith.addf %3, %5 : vector<16x32xf32>
    %7 = math.tanh %6 : vector<16x32xf32>
    %8 = vector.shape_cast %7 : vector<16x32xf32> to vector<2x8x32xf32>
    %c0_6 = arith.constant 0 : index
    %c0_7 = arith.constant 0 : index
    %9 = vector.load %arg4[%c0_6, %c0_7] : memref<1x32xf32, #tpu.memory_space<vmem>>, vector<1x32xf32>
    %10 = vector.shape_cast %9 : vector<1x32xf32> to vector<1x1x32xf32>
    %11 = vector.broadcast %10 : vector<1x1x32xf32> to vector<2x8x32xf32>
    %12 = arith.mulf %8, %11 : vector<2x8x32xf32>
    %cst_8 = arith.constant dense<0.000000e+00> : vector<2x8xf32>
    %13 = vector.multi_reduction <add>, %12, %cst_8 [2] : vector<2x8x32xf32> to vector<2x8xf32>
    %c0_9 = arith.constant 0 : index
    %c0_10 = arith.constant 0 : index
    %14 = memref.load %arg5[%c0_9, %c0_10] : memref<1x1xf32, #tpu.memory_space<smem>>
    %15 = vector.broadcast %14 : f32 to vector<2x8xf32>
    %16 = arith.addf %13, %15 : vector<2x8xf32>
    %cst_11 = arith.constant dense<0xFF800000> : vector<2xf32>
    %17 = vector.multi_reduction <maximumf>, %16, %cst_11 [1] : vector<2x8xf32> to vector<2xf32>
    %18 = vector.shape_cast %17 : vector<2xf32> to vector<2x1xf32>
    %19 = vector.broadcast %18 : vector<2x1xf32> to vector<2x8xf32>
    %20 = arith.subf %16, %19 : vector<2x8xf32>
    %21 = math.exp %20 : vector<2x8xf32>
    %cst_12 = arith.constant dense<0.000000e+00> : vector<2xf32>
    %22 = vector.multi_reduction <add>, %21, %cst_12 [1] : vector<2x8xf32> to vector<2xf32>
    %23 = vector.shape_cast %22 : vector<2xf32> to vector<2x1xf32>
    %cst_13 = arith.constant 1.000000e+00 : f32
    %24 = vector.broadcast %cst_13 : f32 to vector<2x1xf32>
    %25 = arith.divf %24, %23 : vector<2x1xf32>
    %26 = vector.broadcast %25 : vector<2x1xf32> to vector<2x8xf32>
    %27 = arith.mulf %21, %26 : vector<2x8xf32>
    %28 = vector.shape_cast %27 : vector<2x8xf32> to vector<2x8x1xf32>
    %29 = vector.broadcast %28 : vector<2x8x1xf32> to vector<2x8x16xf32>
    %30 = arith.mulf %29, %0 : vector<2x8x16xf32>
    %cst_14 = arith.constant dense<0.000000e+00> : vector<2x16xf32>
    %31 = vector.multi_reduction <add>, %30, %cst_14 [1] : vector<2x8x16xf32> to vector<2x16xf32>
    %c0_15 = arith.constant 0 : index
    %c0_16 = arith.constant 0 : index
    %32 = vector.load %arg6[%c0_15, %c0_16] : memref<16x32xf32, #tpu.memory_space<vmem>>, vector<16x32xf32>
    %cst_17 = arith.constant dense<0.000000e+00> : vector<2x32xf32>
    %33 = tpu.matmul %31, %32, %cst_17 {dimension_numbers = #tpu.dot_dimension_numbers<[1], [0], [0], [1], [0, 0, 1, 1], [], []>} : vector<2x16xf32>, vector<16x32xf32>, vector<2x32xf32> -> vector<2x32xf32>
    %c0_18 = arith.constant 0 : index
    %c0_19 = arith.constant 0 : index
    %34 = vector.load %arg7[%c0_18, %c0_19] : memref<1x32xf32, #tpu.memory_space<vmem>>, vector<1x32xf32>
    %35 = vector.broadcast %34 : vector<1x32xf32> to vector<2x32xf32>
    %36 = arith.addf %33, %35 : vector<2x32xf32>
    %cst_20 = arith.constant 0.000000e+00 : f32
    %37 = vector.broadcast %cst_20 : f32 to vector<2x32xf32>
    %38 = arith.maximumf %36, %37 : vector<2x32xf32>
    %c0_21 = arith.constant 0 : index
    %c0_22 = arith.constant 0 : index
    %39 = vector.load %arg8[%c0_21, %c0_22] : memref<1x32xf32, #tpu.memory_space<vmem>>, vector<1x32xf32>
    %40 = vector.broadcast %39 : vector<1x32xf32> to vector<2x32xf32>
    %41 = arith.mulf %38, %40 : vector<2x32xf32>
    %cst_23 = arith.constant dense<0.000000e+00> : vector<2xf32>
    %42 = vector.multi_reduction <add>, %41, %cst_23 [1] : vector<2x32xf32> to vector<2xf32>
    %c0_24 = arith.constant 0 : index
    %c0_25 = arith.constant 0 : index
    %43 = memref.load %arg9[%c0_24, %c0_25] : memref<1x1xf32, #tpu.memory_space<smem>>
    %44 = vector.broadcast %43 : f32 to vector<2xf32>
    %45 = arith.addf %42, %44 : vector<2xf32>
    %46 = vector.shape_cast %45 : vector<2xf32> to vector<1x2xf32>
    %c0_26 = arith.constant 0 : index
    %c0_27 = arith.constant 0 : index
    %47 = vector.load %arg10[%c0_26, %c0_27] : memref<1x2xf32, #tpu.memory_space<vmem>>, vector<1x2xf32>
    tpu.vector_store %arg10[%c0_26, %c0_27], %46 {strides = array<i32>} : memref<1x2xf32, #tpu.memory_space<vmem>>, vector<1x2xf32>,
    return
  }
  func.func @transform_0(%arg0: i32) -> (i32, i32, i32) {
    %c0_i32 = arith.constant 0 : i32
    %c0_i32_0 = arith.constant 0 : i32
    %c0_i32_1 = arith.constant 0 : i32
    return %arg0, %c0_i32, %c0_i32_0 : i32, i32, i32
  }
  func.func @transform_1(%arg0: i32) -> (i32, i32) {
    %c0_i32 = arith.constant 0 : i32
    %c0_i32_0 = arith.constant 0 : i32
    %c0_i32_1 = arith.constant 0 : i32
    return %c0_i32, %c0_i32_0 : i32, i32
  }
  func.func @transform_2(%arg0: i32) -> (i32, i32) {
    %c0_i32 = arith.constant 0 : i32
    %c0_i32_0 = arith.constant 0 : i32
    %c0_i32_1 = arith.constant 0 : i32
    return %c0_i32, %c0_i32_0 : i32, i32
  }
  func.func @transform_3(%arg0: i32) -> (i32, i32) {
    %c0_i32 = arith.constant 0 : i32
    %c0_i32_0 = arith.constant 0 : i32
    %c0_i32_1 = arith.constant 0 : i32
    return %c0_i32, %c0_i32_0 : i32, i32
  }
  func.func @transform_4(%arg0: i32) -> (i32, i32) {
    %c0_i32 = arith.constant 0 : i32
    %c0_i32_0 = arith.constant 0 : i32
    %c0_i32_1 = arith.constant 0 : i32
    return %c0_i32, %c0_i32_0 : i32, i32
  }
  func.func @transform_5(%arg0: i32) -> (i32, i32) {
    %c0_i32 = arith.constant 0 : i32
    %c0_i32_0 = arith.constant 0 : i32
    %c0_i32_1 = arith.constant 0 : i32
    return %c0_i32, %c0_i32_0 : i32, i32
  }
  func.func @transform_6(%arg0: i32) -> (i32, i32) {
    %c0_i32 = arith.constant 0 : i32
    %c0_i32_0 = arith.constant 0 : i32
    %c0_i32_1 = arith.constant 0 : i32
    return %c0_i32, %c0_i32_0 : i32, i32
  }
  func.func @transform_7(%arg0: i32) -> (i32, i32) {
    %c0_i32 = arith.constant 0 : i32
    %c0_i32_0 = arith.constant 0 : i32
    %c0_i32_1 = arith.constant 0 : i32
    return %c0_i32, %c0_i32_0 : i32, i32
  }
  func.func @transform_8(%arg0: i32) -> (i32, i32) {
    %c0_i32 = arith.constant 0 : i32
    %c0_i32_0 = arith.constant 0 : i32
    %c0_i32_1 = arith.constant 0 : i32
    return %c0_i32, %c0_i32_0 : i32, i32
  }
  func.func @transform_9(%arg0: i32) -> (i32, i32) {
    %c0_i32 = arith.constant 0 : i32
    %c0_i32_0 = arith.constant 0 : i32
    return %c0_i32, %arg0 : i32, i32
  }
}

</mosaic_0001>

<bundles_post_ra>
// kernel: tpu_custom_call.1
= control target key start
LH: loop header
LB: loop body
LE: loop exit
PB: predicated region body
PF: predicated region fallthrough
CT: control target
= control target key end

     0   :  { %16 = vsyncpa [#allocation5], 0  ;;  %s662_s0 = inlined_call_operand.hbm [shape: f32[2,8,16], index: 0, kind: input, shape index: {}]   ;;  %s663_s1 = inlined_call_operand.hbm [shape: f32[16,32], index: 1, kind: input, shape index: {}]   ;;  %s664_s2 = inlined_call_operand.vmem [shape: f32[1,32], index: 2, kind: input, shape index: {}]   ;;  %s665_s3 = inlined_call_operand.vmem [shape: f32[1,32], index: 3, kind: input, shape index: {}]   ;;  %s666_s4 = inlined_call_operand.<no memory space> [shape: f32[1,1], index: 4, kind: input, shape index: {}]   ;;  %s667_s5 = inlined_call_operand.hbm [shape: f32[16,32], index: 5, kind: input, shape index: {}]   ;;  %s668_s6 = inlined_call_operand.vmem [shape: f32[1,32], index: 6, kind: input, shape index: {}]   ;;  %s669_s7 = inlined_call_operand.vmem [shape: f32[1,32], index: 7, kind: input, shape index: {}]   ;;  %s670_s8 = inlined_call_operand.<no memory space> [shape: f32[1,1], index: 8, kind: input, shape index: {}]   ;;  %s671_s9 = inlined_call_operand.hbm [shape: f32[1,2], index: 9, kind: output, shape index: {}]  }
   0x1   :  { %17 = vsyncpa [#allocation8], 0 }
   0x2   :  { %18 = vsyncpa [#allocation6], 0  ;;  %s548_s30 = smov [#allocation7]   ;;  %s549_s11 = smov [#allocation4]  }
   0x3   :  { %s36_s10 = sshll.u32 %s548_s30, 4  ;;  %s24_s12 = sshll.u32 %s549_s11, 4  ;;  %s37_s10 = int_to_ptr.vmem [resolvable:$true] %s36_s10  ;;  %s25_s12 = int_to_ptr.vmem [resolvable:$true] %s24_s12 }
   0x4   :  { %s470_s13 = scalar_lea.vmem %s37_s10, 256  ;;  %p475_p1 = scmp.lt.s32.totalorder %s37_s10, %s37_s10 }
   0x5   :  { %p471_p0 = scmp.ne.s32.totalorder %s37_s10, %s470_s13  ;;  %p476_p2 = scmp.lt.s32.totalorder %s470_s13, %s470_s13 }
   0x7   :  { %p477_p3 = por %p476_p2, %p475_p1 }
   0x9   :  { %p478_p4 = pnand %p477_p3, %p471_p0 }
   0xb   :  { %481 = shalt.err (!%p478_p4)
}
   0xc   :  { %s550_s14 = smov 128   ;;  %s551_s15 = smov 8  }
   0xd   :  { %42 = dma.hbm_to_vmem [thread:$0]  %s663_s1, 256, %s37_s10, [#allocation8], %s550_s14, %s550_s14, %s551_s15  }
   0xe   :  { %s490_s18 = scalar_lea.vmem %s25_s12, 256  ;;  %p495_p6 = scmp.lt.s32.totalorder %s25_s12, %s25_s12 }
   0xf   :  { %p491_p5 = scmp.ne.s32.totalorder %s25_s12, %s490_s18  ;;  %p496_p7 = scmp.lt.s32.totalorder %s490_s18, %s490_s18 }
  0x11   :  { %p497_p8 = por %p496_p7, %p495_p6 }
  0x13   :  { %p498_p9 = pnand %p497_p8, %p491_p5 }
  0x15   :  { %501 = shalt.err (!%p498_p9)
}
  0x16   :  { %30 = dma.hbm_to_vmem [thread:$0]  %s662_s0, 256, %s25_s12, [#allocation5], %s550_s14, %s550_s14, %s551_s15  }
  0x17   :  { %s552_s21 = smov [#allocation9]  }
  0x18   :  { %s54_s22 = sshll.u32 %s552_s21, 4  ;;  %s55_s22 = int_to_ptr.vmem [resolvable:$true] %s54_s22 }
  0x19   :  { %s510_s23 = scalar_lea.vmem %s55_s22, 256  ;;  %p515_p11 = scmp.lt.s32.totalorder %s55_s22, %s55_s22 }
  0x1a   :  { %p511_p10 = scmp.ne.s32.totalorder %s55_s22, %s510_s23  ;;  %p516_p12 = scmp.lt.s32.totalorder %s510_s23, %s510_s23 }
  0x1c   :  { %p517_p13 = por %p516_p12, %p515_p11 }
  0x1e   :  { %p518_p0 = pnand %p517_p13, %p511_p10 }
  0x20   :  { %521 = shalt.err (!%p518_p0)
}
  0x21   :  { %60 = dma.hbm_to_vmem [thread:$0]  %s667_s5, 256, %s55_s22, [#allocation8], %s550_s14, %s550_s14, %s551_s15  }
  0x22   :  { %542 = dma.done.wait [#allocation5], 256  }
  0x23   :  { %543 = vsyncadd [#allocation5], 4294967040 }
  0x24   :  { %544 = dma.done.wait [#allocation8], 512  }
  0x25   :  { %545 = vsyncadd [#allocation8], 4294966784  ;;  %vm87_vm0 = vcmask 130048   ;;  %v79_v0 = vld [vmem:[#allocation7 + $0x8] sm:$0xff]  ;;  %v78_v1 = vld [vmem:[#allocation7] sm:$0xff]  ;;  %vm180_vm1 = vcmask 261120   ;;  %v193_v16 = vlaneseq  ;;  %v188_v19 = vstv %s666_s4 }
  0x26   :  { %v616_v2 = vld [vmem:[#allocation4] sm:$0xff]  ;;  %427 = vmatprep.subr.mxu0 %v79_v0  ;;  %v620_v3 = vld [vmem:[#allocation4 + $0x8] sm:$0xff]  ;;  %vm203_vm2 = vcmask 1041409   ;;  %vm206_vm3 = vcmask 58368   ;;  %v553_v29 = vmov 0   ;;  %v554_v53 = vmov 0.0  }
  0x27   :  { %431 = vmatprep.mubr.msk.f32.mxu0 %vm87_vm0, %v616_v2  ;;  %428 = vmatpush3.msra.mxu0 %v79_v0  ;;  %v413_v4 = vld [vmem:[%s664_s2] ss:$0 sm:$0xff]  ;;  %v194_v17 = vand.u32 127, %v193_v16  ;;  %v196_v18 = vshrl.u32 %v193_v16, 7  ;;  %v290_v54 = vld [vmem:[#allocation9 + $0x8] sm:$0xff]  ;;  %vm555_vm4 = vmmov 0  }
  0x28   :  { %429 = vmatprep.subr.mxu0 %v78_v1  ;;  %v416_v11 = vld [vmem:[%s665_s3] ss:$0 sm:$0xff]  ;;  %451 = vset.pattern.permute.xlu0 %v553_v29  ;;  %vm382_vm5 = vcmask 254976   ;;  %s556_s11 = smov [#allocation10]   ;;  %vm395_vm6 = vcmask 8192  }
  0x29   :  { %430 = vmatpush3.msra.mxu0 %v78_v1  ;;  %v633_v21 = vsub.s32 %v194_v17, %v196_v18  ;;  %450 = vset.pattern.permute.xlu1 %v553_v29  ;;  %v213_v30 = vsub.s32 0, %v196_v18  ;;  %v217_v31 = vsub.s32 1, %v196_v18  ;;  %v289_v55 = vld [vmem:[#allocation9] sm:$0xff]  ;;  %s403_s12 = sshll.u32 %s556_s11, 4  ;;  %s404_s12 = int_to_ptr.vmem [resolvable:$true] %s403_s12 }
  0x2a   :  { %432 = vmatmul.mubr.msk.f32.vlgmr.msra.gmra.mxu0 %vm87_vm0, %v620_v3  ;;  %434 = vmatprep.subr.mxu1 %v554_v53  ;;  %p527_p2 = scmp.lt.s32.totalorder %s404_s12, %s404_s12 }
  0x2b   :  { %435 = vmatpush3.msra.mxu1 %v290_v54  ;;  %438 = vmatprep.mubr.msk.f32.mxu1 %vm555_vm4, %v554_v53 }
  0x2c   :  { %436 = vmatprep.subr.mxu1 %v554_v53 }
  0x2d   :  { %437 = vmatpush3.msra.mxu1 %v289_v55 }
  0xea   :  { %v433_v5 = vpop.f32.mrf.mxu0 }
  0xeb   :  { %v166_v6 = vadd.f32 %v433_v5, %v413_v4 }
  0xec   :  { %v160_v7 = vpop.f32.mrf.mxu0 }
  0xed   :  { %v161_v8 = vadd.f32 %v413_v4, %v160_v7  ;;  %452 = vtanh.f32 %v166_v6 }
  0xef   :  { %454 = vtanh.f32 %v161_v8 }
  0xfa   :  { %v453_v9 = vpop.eup %452 }
  0xfb   :  { %v179_v14 = vmul.f32 %v453_v9, %v416_v11 }
  0xfc   :  { %v455_v10 = vpop.eup %454 }
  0xfd   :  { %v178_v12 = vmul.f32 %v455_v10, %v416_v11  ;;  %v184_v15 = vsel %vm180_vm1, %v179_v14, 0.0 }
  0xff   :  { %v181_v13 = vsel %vm180_vm1, %v178_v12, 0.0 }
 0x100   :  { %182 = vadd.xlane.f32.xlu0 %v181_v13 }
 0x104   :  { %185 = vadd.xlane.f32.xlu0 %v184_v15  ;;  %v419_v15 = vld [vmem:[%s669_s7] ss:$0 sm:$0xff]  ;;  %s526_s7 = scalar_lea.vmem %s404_s12, 32 }
 0x189   :  { %v183_v20 = vpop.xlane.xlu0 %182 }
 0x18a   :  { %v189_v22 = vadd.f32 %v188_v19, %v183_v20 }
 0x18c   :  { %v198_v25 = vrot.slane %v189_v22, %v633_v21 }
 0x18d   :  { %v186_v23 = vpop.xlane.xlu0 %185 }
 0x18e   :  { %v190_v24 = vadd.f32 %v188_v19, %v186_v23  ;;  %v387_v19 = vstv %s670_s8 }
 0x190   :  { %v202_v26 = vrot.slane %v190_v24, %v633_v21 }
 0x192   :  { %v204_v27 = vsel %vm203_vm2, %v202_v26, %v198_v25 }
 0x193   :  { %v207_v28 = vsel %vm206_vm3, %v204_v27, -inf }
 0x194   :  { %208 = vmax.xlane.f32.xlu1 %v207_v28 }
 0x21d   :  { %v209_v32 = vpop.xlane.xlu1 %208 }
 0x21e   :  { %v214_v33 = vrot.slane %v209_v32, %v213_v30  ;;  %v218_v34 = vrot.slane %v209_v32, %v217_v31 }
 0x220   :  { %v221_v35 = vsub.f32 %v189_v22, %v214_v33  ;;  %v222_v36 = vsub.f32 %v190_v24, %v218_v34 }
 0x222   :  { %v223_v37 = vmul.f32 1.442695, %v221_v35  ;;  %v225_v38 = vmul.f32 1.442695, %v222_v36 }
 0x224   :  { %456 = vpow2.f32 %v223_v37 }
 0x225   :  { %458 = vpow2.f32 %v225_v38 }
 0x231   :  { %v457_v39 = vpop.eup %456 }
 0x232   :  { %v459_v40 = vpop.eup %458  ;;  %230 = vperm.xlu1 %450, %v457_v39  }
 0x233   :  { %233 = vperm.xlu0 %451, %v459_v40  }
 0x2ad   :  { %v231_v41 = vpop.permute.xlu1 %230 }
 0x2ae   :  { %v234_v42 = vpop.permute.xlu0 %233  ;;  %v238_v43 = vrot.slane %v231_v41, %v633_v21 }
 0x2af   :  { %v242_v44 = vrot.slane %v234_v42, %v633_v21 }
 0x2b1   :  { %v243_v45 = vsel %vm203_vm2, %v242_v44, %v238_v43 }
 0x2b2   :  { %v245_v46 = vsel %vm206_vm3, %v243_v45, 0.0 }
 0x2b3   :  { %246 = vadd.xlane.f32.xlu1 %v245_v46 }
 0x33c   :  { %v247_v47 = vpop.xlane.xlu1 %246 }
 0x33d   :  { %460 = vrcp.f32 %v247_v47 }
 0x34a   :  { %v461_v48 = vpop.eup %460 }
 0x34b   :  { %v254_v49 = vrot.slane %v461_v48, %v213_v30  ;;  %v258_v51 = vrot.slane %v461_v48, %v217_v31 }
 0x34d   :  { %v261_v50 = vmul.f32 %v457_v39, %v254_v49  ;;  %v262_v52 = vmul.f32 %v459_v40, %v258_v51 }
 0x34f   :  { %265 = vperm.xlu0 %451, %v261_v50  }
 0x353   :  { %270 = vperm.xlu0 %451, %v262_v52  }
 0x3ca   :  { %v266_v56 = vpop.permute.xlu0 %265 }
 0x3cb   :  { %v273_v57 = vmul.f32 %v266_v56, %v616_v2 }
 0x3cd   :  { %v275_v58 = vsel %vm87_vm0, %v273_v57, 0.0 }
 0x3ce   :  { %v276_v59 = vrot.slane %v275_v58, 4  ;;  %v271_v60 = vpop.permute.xlu0 %270 }
 0x3cf   :  { %v274_v61 = vmul.f32 %v271_v60, %v620_v3  ;;  %v417_v3 = vld [vmem:[%s668_s6] ss:$0 sm:$0xff]  ;;  %s522_s6 = scalar_lea.vmem %s404_s12, 16 }
 0x3d0   :  { %v277_v62 = vadd.f32 %v276_v59, %v275_v58  ;;  %p523_p1 = scmp.ne.s32.totalorder %s404_s12, %s522_s6  ;;  %p528_p3 = scmp.lt.s32.totalorder %s526_s7, %s522_s6 }
 0x3d1   :  { %v282_v63 = vsel %vm87_vm0, %v274_v61, 0.0 }
 0x3d2   :  { %v278_v0 = vrot.slane %v277_v62, 2  ;;  %v283_v1 = vrot.slane %v282_v63, 4  ;;  %p529_p4 = por %p528_p3, %p527_p2 }
 0x3d4   :  { %v279_v4 = vadd.f32 %v278_v0, %v277_v62  ;;  %v284_v5 = vadd.f32 %v283_v1, %v282_v63  ;;  %p530_p5 = pnand %p529_p4, %p523_p1 }
 0x3d6   :  { %v285_v6 = vrot.slane %v284_v5, 2  ;;  %v280_v7 = vrot.slane %v279_v4, 1 }
 0x3d8   :  { %v286_v8 = vadd.f32 %v285_v6, %v284_v5  ;;  %v281_v10 = vadd.f32 %v280_v7, %v279_v4 }
 0x3da   :  { %v287_v9 = vrot.slane %v286_v8, 1 }
 0x3dc   :  { %v288_v11 = vadd.f32 %v287_v9, %v286_v8 }
 0x3de   :  { %v300_v2 = vsel %vm203_vm2, %v288_v11, %v281_v10 }
 0x3df   :  { %439 = vmatmul.mubr.msk.f32.vlgmr.msra.gmra.mxu1 %vm87_vm0, %v300_v2 }
 0x49f   :  { %v369_v12 = vpop.f32.mrf.mxu1 }
 0x4a0   :  { %v370_v13 = vadd.f32 %v417_v3, %v369_v12 }
 0x4a1   :  { %v440_v14 = vpop.f32.mrf.mxu1 }
 0x4a2   :  { %v373_v16 = vmax.f32 %v370_v13, 0.0 }
 0x4a4   :  { %v381_v17 = vmul.f32 %v419_v15, %v373_v16 }
 0x4a6   :  { %v383_v18 = vsel %vm382_vm5, %v381_v17, 0.0 }
 0x4a7   :  { %384 = vadd.xlane.f32.xlu1 %v383_v18 }
 0x530   :  { %v385_v20 = vpop.xlane.xlu1 %384 }
 0x531   :  { %v388_v22 = vadd.f32 %v387_v19, %v385_v20 }
 0x533   :  { %v393_v23 = vrot.slane %v388_v22, %v633_v21 }
 0x535   :  { %396 = vst.msk [vmem:[#allocation10] sm:$0x1] %vm395_vm6, %v393_v23 }
 0x536   :  { %533 = shalt.err (!%p530_p5)
}
 0x537   :  { %406 = dma.vmem_to_hbm [thread:$0]  %s404_s12, 16, %s671_s9, [#allocation6]  }
 0x538   :  { %546 = dma.done.wait [#allocation6], 16  }
 0x539   :  { %547 = vsyncadd [#allocation6], 4294967280 }
 0x53a   :  { %410 = vsyncpa [#allocation5], 1 }
 0x53b   :  { %411 = vsyncpa [#allocation8], 1 }
 0x53c   :  { %412 = vsyncpa [#allocation6], 1 }

</bundles_post_ra>
